<compile_context>
chip_gen: v5e
topology: v5e:2x2
jax: 0.10.0
libtpu: 0.0.40
codegen_flags: <defaults>
</compile_context>

<pallas_src>
import functools

import jax
import jax.numpy as jnp
from jax.experimental import pallas as pl
from jax.experimental.pallas import tpu as pltpu

_NEG_PAD = -1e30  # softmax/argmax-neutral padding value for the class axis


def _round_up(x, m):
    return (x + m - 1) // m * m


def _focal_distill_kernel(new_ref, old_ref, gt_ref, dist_ref, w_ref, *,
                          tile_rows, fd_alpha, fd_beta, focus_type,
                          distillation_type, kl_temperature):
    """One grid step: rows [i*tile_rows, (i+1)*tile_rows) of the padded batch."""
    i = pl.program_id(0)
    new = new_ref[...].astype(jnp.float32)            # (TR, CP)
    old = old_ref[...].astype(jnp.float32)            # (TR, CP)
    tr, cp = new.shape

    # gt lives in VMEM as one full (N_pad, 1) block; slice this tile's rows.
    row0 = pl.multiple_of(i * tile_rows, tile_rows)
    gt = gt_ref[pl.ds(row0, tile_rows), :]            # (TR, 1) int32

    # Row maxima reused for both argmax (x == xmax) and the softmax shift.
    old_max = jnp.max(old, axis=1, keepdims=True)     # (TR, 1)
    new_max = jnp.max(new, axis=1, keepdims=True)     # (TR, 1)

    col = jax.lax.broadcasted_iota(jnp.int32, (tr, cp), 1)

    def first_argmax(x, xmax):
        # first index of the row max == torch.argmax tie-breaking
        return jnp.min(jnp.where(x == xmax, col, cp), axis=1, keepdims=True)

    # Only compute the argmaxes the focus type actually needs.
    if focus_type == 'old_correct':
        focus = first_argmax(old, old_max) == gt
    elif focus_type == 'neg_flip':
        old_c = first_argmax(old, old_max) == gt
        new_c = first_argmax(new, new_max) == gt
        focus = jnp.logical_and(old_c, jnp.logical_not(new_c))
    elif focus_type == 'new_incorrect':
        focus = jnp.logical_not(first_argmax(new, new_max) == gt)
    else:
        raise ValueError(f'Unknown focus type: {focus_type}')
    w_ref[...] = focus.astype(jnp.float32) * float(fd_beta) + float(fd_alpha)

    if distillation_type == 'kl':
        # KLDivLoss(log_softmax(new/T), softmax(old/T)).sum(1) * T^2, fused:
        #   row_kl = sum(old_exp*(old_s - new_s))/old_sum + new_lse - log(old_sum)
        t = float(kl_temperature)
        inv_t = 1.0 / t
        new_s = (new - new_max) * inv_t               # (TR, CP)
        old_s = (old - old_max) * inv_t               # (TR, CP)
        old_exp = jnp.exp(old_s)
        old_sum = jnp.sum(old_exp, axis=1, keepdims=True)                  # (TR, 1)
        new_lse = jnp.log(jnp.sum(jnp.exp(new_s), axis=1, keepdims=True))  # (TR, 1)
        num = jnp.sum(old_exp * (old_s - new_s), axis=1, keepdims=True)    # (TR, 1)
        # Exact reciprocal (approx=True error would be amplified by T^2).
        row_kl = num * pl.reciprocal(old_sum) + (new_lse - jnp.log(old_sum))
        dist_ref[...] = row_kl * (t * t)
    elif distillation_type == 'l2':
        d = new - old                                  # pad columns cancel exactly
        dist_ref[...] = jnp.sum(d * d, axis=1, keepdims=True)
    else:
        raise ValueError(f'Unknown loss type: {distillation_type}')


def focal_distillation_loss(new_pred, old_pred, gt, *, fd_alpha=1, fd_beta=5,
                            focus_type='old_correct', distillation_type='kl',
                            kl_temperature=100, tile_rows=None):
    """Pallas TPU implementation of FocalDistillationLoss.forward."""
    if distillation_type not in ('kl', 'l2'):
        raise ValueError(f'Unknown loss type: {distillation_type}')
    if focus_type not in ('old_correct', 'neg_flip', 'new_incorrect'):
        raise ValueError(f'Unknown focus type: {focus_type}')
    n, c = new_pred.shape
    assert old_pred.shape == (n, c), (old_pred.shape, (n, c))
    # TODO(synk): the class-count-mismatch branch (boolean-mask filtering with a
    # data-dependent output shape) has no clean Pallas equivalent; equal class
    # counts are required here.

    # Lane-dense class axis.
    c_pad = _round_up(c, 128)

    # Tile sizing: target ~4 MiB for the double-buffered pair of logit inputs
    # (2 inputs x 2 buffers x tile_rows x c_pad x 4B); cap at 512 rows (past
    # ~512 the roofline gain is <2%), keep a multiple of 16 (bf16-safe).
    if tile_rows is None:
        tile_rows = (4 * 1024 * 1024) // (2 * 2 * c_pad * 4)
        tile_rows = min(512, tile_rows)
    tile_rows = max(16, _round_up(int(tile_rows), 16))
    tile_rows = min(tile_rows, _round_up(n, 16))
    n_pad = _round_up(n, tile_rows)

    newp = jnp.pad(new_pred, ((0, n_pad - n), (0, c_pad - c)),
                   constant_values=_NEG_PAD)
    oldp = jnp.pad(old_pred, ((0, n_pad - n), (0, c_pad - c)),
                   constant_values=_NEG_PAD)
    gt2d = jnp.pad(gt.astype(jnp.int32), (0, n_pad - n)).reshape(n_pad, 1)

    kernel = functools.partial(
        _focal_distill_kernel,
        tile_rows=tile_rows, fd_alpha=fd_alpha, fd_beta=fd_beta,
        focus_type=focus_type, distillation_type=distillation_type,
        kl_temperature=kl_temperature)

    dist_rows, w_rows = pl.pallas_call(
        kernel,
        out_shape=(jax.ShapeDtypeStruct((n_pad, 1), jnp.float32),
                   jax.ShapeDtypeStruct((n_pad, 1), jnp.float32)),
        grid=(n_pad // tile_rows,),
        in_specs=[
            pl.BlockSpec((tile_rows, c_pad), lambda i: (i, 0)),
            pl.BlockSpec((tile_rows, c_pad), lambda i: (i, 0)),
            pl.BlockSpec((n_pad, 1), lambda i: (0, 0)),   # gt: fetched once
        ],
        out_specs=(pl.BlockSpec((tile_rows, 1), lambda i: (i, 0)),
                   pl.BlockSpec((tile_rows, 1), lambda i: (i, 0))),
        compiler_params=pltpu.CompilerParams(
            dimension_semantics=("parallel",),            # no carried state
            vmem_limit_bytes=32 * 1024 * 1024),
    )(newp, oldp, gt2d)

    sl = dist_rows[:n, 0]   # per-sample distillation partial
    w = w_rows[:n, 0]       # per-sample focal weight
    if distillation_type == 'kl':
        # torch: sample_loss [N] * loss_weights [N,1] -> [N,N] broadcast, .mean()
        return jnp.sum(sl) * jnp.sum(w) / float(n * n)
    # l2: sample_loss [N,C] * loss_weights [N,1] -> [N,C], .mean()
    return jnp.sum(sl * w) / float(n * c)


def _reference_loss(new_pred, old_pred, gt, fd_alpha, fd_beta, focus_type,
                    distillation_type, kl_temperature):
    """Pure-JAX reference reproducing the torch semantics exactly."""
    old_correct = jnp.argmax(old_pred, axis=1) == gt
    new_correct = jnp.argmax(new_pred, axis=1) == gt
    if focus_type == 'old_correct':
        focus = old_correct
    elif focus_type == 'neg_flip':
        focus = old_correct & (~new_correct)
    else:  # 'new_incorrect'
        focus = ~new_correct
    w = focus.astype(jnp.int32)[:, None] * fd_beta + fd_alpha        # (N, 1)
    if distillation_type == 'kl':
        t = float(kl_temperature)
        log_p_new = jax.nn.log_softmax(new_pred / t, axis=1)
        p_old = jax.nn.softmax(old_pred / t, axis=1)
        sample_loss = jnp.sum(p_old * (jnp.log(p_old) - log_p_new),
                              axis=1) * t ** 2                       # (N,)
    else:
        sample_loss = (new_pred - old_pred) ** 2                     # (N, C)
    return jnp.mean(sample_loss * w)   # same broadcast as torch


if __name__ == "__main__":
    key = jax.random.PRNGKey(0)
    k1, k2, k3, k4, k5, k6 = jax.random.split(key, 6)

    # Shapes consistent with a classification distillation loss.
    N, C = 64, 32
    new_pred = jax.random.normal(k1, (N, C), jnp.float32)
    old_pred = jax.random.normal(k2, (N, C), jnp.float32)
    gt = jax.random.randint(k3, (N,), 0, C, jnp.int32)

    # 1) Default config (kl, T=100).  T^2 = 1e4 amplifies f32 ulp-level
    #    differences in the log-sum-exp terms, so the kernel and the XLA
    #    reference legitimately differ at the ~1e-3 relative level; both are
    #    equally close to the exact value.  Hence the relaxed tolerance here;
    #    the well-conditioned checks below use tight tolerances.
    loss = jax.block_until_ready(focal_distillation_loss(new_pred, old_pred, gt))
    ref = _reference_loss(new_pred, old_pred, gt, 1, 5, 'old_correct', 'kl', 100)
    assert jnp.allclose(loss, ref, rtol=1e-2, atol=1e-4), (loss, ref)

    # 2) Same inputs, T=1 (well-conditioned) -> tight tolerance.
    loss1 = jax.block_until_ready(
        focal_distillation_loss(new_pred, old_pred, gt, kl_temperature=1))
    ref1 = _reference_loss(new_pred, old_pred, gt, 1, 5, 'old_correct', 'kl', 1)
    assert jnp.allclose(loss1, ref1, rtol=1e-4, atol=1e-4), (loss1, ref1)

    # 3) Non-aligned shapes (row+class padding), neg_flip focus, and l2 type.
    N2, C2 = 37, 20
    new2 = jax.random.normal(k4, (N2, C2), jnp.float32)
    old2 = jax.random.normal(k5, (N2, C2), jnp.float32)
    gt2 = jax.random.randint(k6, (N2,), 0, C2, jnp.int32)

    loss2 = jax.block_until_ready(
        focal_distillation_loss(new2, old2, gt2, focus_type='neg_flip',
                                kl_temperature=1))
    ref2 = _reference_loss(new2, old2, gt2, 1, 5, 'neg_flip', 'kl', 1)
    assert jnp.allclose(loss2, ref2, rtol=1e-4, atol=1e-4), (loss2, ref2)

    loss3 = jax.block_until_ready(
        focal_distillation_loss(new2, old2, gt2, distillation_type='l2'))
    ref3 = _reference_loss(new2, old2, gt2, 1, 5, 'old_correct', 'l2', 100)
    assert jnp.allclose(loss3, ref3, rtol=1e-4, atol=1e-5), (loss3, ref3)

    # 4) new_incorrect focus path.
    loss4 = jax.block_until_ready(
        focal_distillation_loss(new2, old2, gt2, focus_type='new_incorrect',
                                kl_temperature=1))
    ref4 = _reference_loss(new2, old2, gt2, 1, 5, 'new_incorrect', 'kl', 1)
    assert jnp.allclose(loss4, ref4, rtol=1e-4, atol=1e-4), (loss4, ref4)

    print("KERNEL_OK")
</pallas_src>

<mosaic_0001>
module attributes {stable_mosaic.version = 11 : i64} {
  func.func @_focal_distill_kernel(%arg0: i32, %arg1: memref<64x128xf32, #tpu.memory_space<vmem>>, %arg2: memref<64x128xf32, #tpu.memory_space<vmem>>, %arg3: memref<64x1xi32, #tpu.memory_space<vmem>>, %arg4: memref<64x1xf32, #tpu.memory_space<vmem>>, %arg5: memref<64x1xf32, #tpu.memory_space<vmem>>) attributes {dimension_semantics = [#tpu.dimension_semantics<parallel>], iteration_bounds = array<i64: 1>, scalar_prefetch = 0 : i64, scratch_operands = 0 : i64, tpu.core_type = #tpu.core_type<tc>, window_params = [{transform_indices = @transform_0, window_bounds = array<i64: 64, 128>}, {transform_indices = @transform_1, window_bounds = array<i64: 64, 128>}, {pipeline_mode = #tpu.pipeline_mode<synchronous>, transform_indices = @transform_2, window_bounds = array<i64: 64, 1>}, {transform_indices = @transform_3, window_bounds = array<i64: 64, 1>}, {transform_indices = @transform_4, window_bounds = array<i64: 64, 1>}]} {
    %c0 = arith.constant 0 : index
    %c0_0 = arith.constant 0 : index
    %0 = vector.load %arg1[%c0, %c0_0] : memref<64x128xf32, #tpu.memory_space<vmem>>, vector<64x128xf32>
    %c0_1 = arith.constant 0 : index
    %c0_2 = arith.constant 0 : index
    %1 = vector.load %arg2[%c0_1, %c0_2] : memref<64x128xf32, #tpu.memory_space<vmem>>, vector<64x128xf32>
    %c64_i32 = arith.constant 64 : i32
    %2 = arith.muli %arg0, %c64_i32 : i32
    %3 = tpu.assume_multiple %2, 64 : i32
    %4 = arith.index_cast %3 : i32 to index
    %c0_3 = arith.constant 0 : index
    %5 = vector.load %arg3[%4, %c0_3] : memref<64x1xi32, #tpu.memory_space<vmem>>, vector<64x1xi32>
    %cst = arith.constant dense<0xFF800000> : vector<64xf32>
    %6 = vector.multi_reduction <maximumf>, %1, %cst [1] : vector<64x128xf32> to vector<64xf32>
    %7 = vector.shape_cast %6 : vector<64xf32> to vector<64x1xf32>
    %cst_4 = arith.constant dense<0xFF800000> : vector<64xf32>
    %8 = vector.multi_reduction <maximumf>, %0, %cst_4 [1] : vector<64x128xf32> to vector<64xf32>
    %9 = vector.shape_cast %8 : vector<64xf32> to vector<64x1xf32>
    %10 = tpu.iota {dimensions = array<i32: 1>} : vector<64x128xi32>
    %11 = vector.broadcast %7 : vector<64x1xf32> to vector<64x128xf32>
    %12 = arith.cmpf oeq, %1, %11 : vector<64x128xf32>
    %c128_i32 = arith.constant 128 : i32
    %13 = vector.broadcast %c128_i32 : i32 to vector<64x128xi32>
    %14 = arith.select %12, %10, %13 : vector<64x128xi1>, vector<64x128xi32>
    %cst_5 = arith.constant dense<2147483647> : vector<64xi32>
    %15 = vector.multi_reduction <minsi>, %14, %cst_5 [1] : vector<64x128xi32> to vector<64xi32>
    %16 = vector.shape_cast %15 : vector<64xi32> to vector<64x1xi32>
    %17 = arith.cmpi eq, %16, %5 : vector<64x1xi32>
    %18 = arith.extui %17 : vector<64x1xi1> to vector<64x1xi32>
    %19 = arith.sitofp %18 : vector<64x1xi32> to vector<64x1xf32>
    %cst_6 = arith.constant 5.000000e+00 : f32
    %20 = vector.broadcast %cst_6 : f32 to vector<64x1xf32>
    %21 = arith.mulf %19, %20 : vector<64x1xf32>
    %cst_7 = arith.constant 1.000000e+00 : f32
    %22 = vector.broadcast %cst_7 : f32 to vector<64x1xf32>
    %23 = arith.addf %21, %22 : vector<64x1xf32>
    %c0_8 = arith.constant 0 : index
    %c0_9 = arith.constant 0 : index
    %24 = vector.load %arg5[%c0_8, %c0_9] : memref<64x1xf32, #tpu.memory_space<vmem>>, vector<64x1xf32>
    tpu.vector_store %arg5[%c0_8, %c0_9], %23 {strides = array<i32>} : memref<64x1xf32, #tpu.memory_space<vmem>>, vector<64x1xf32>,
    %25 = vector.broadcast %9 : vector<64x1xf32> to vector<64x128xf32>
    %26 = arith.subf %0, %25 : vector<64x128xf32>
    %cst_10 = arith.constant 0.00999999977 : f32
    %27 = vector.broadcast %cst_10 : f32 to vector<64x128xf32>
    %28 = arith.mulf %26, %27 : vector<64x128xf32>
    %29 = vector.broadcast %7 : vector<64x1xf32> to vector<64x128xf32>
    %30 = arith.subf %1, %29 : vector<64x128xf32>
    %cst_11 = arith.constant 0.00999999977 : f32
    %31 = vector.broadcast %cst_11 : f32 to vector<64x128xf32>
    %32 = arith.mulf %30, %31 : vector<64x128xf32>
    %33 = math.exp %32 : vector<64x128xf32>
    %cst_12 = arith.constant dense<0.000000e+00> : vector<64xf32>
    %34 = vector.multi_reduction <add>, %33, %cst_12 [1] : vector<64x128xf32> to vector<64xf32>
    %35 = vector.shape_cast %34 : vector<64xf32> to vector<64x1xf32>
    %36 = math.exp %28 : vector<64x128xf32>
    %cst_13 = arith.constant dense<0.000000e+00> : vector<64xf32>
    %37 = vector.multi_reduction <add>, %36, %cst_13 [1] : vector<64x128xf32> to vector<64xf32>
    %38 = vector.shape_cast %37 : vector<64xf32> to vector<64x1xf32>
    %39 = math.log %38 : vector<64x1xf32>
    %40 = arith.subf %32, %28 : vector<64x128xf32>
    %41 = arith.mulf %33, %40 : vector<64x128xf32>
    %cst_14 = arith.constant dense<0.000000e+00> : vector<64xf32>
    %42 = vector.multi_reduction <add>, %41, %cst_14 [1] : vector<64x128xf32> to vector<64xf32>
    %43 = vector.shape_cast %42 : vector<64xf32> to vector<64x1xf32>
    %44 = tpu.reciprocal %35 : vector<64x1xf32> -> vector<64x1xf32>
    %45 = arith.mulf %43, %44 : vector<64x1xf32>
    %46 = math.log %35 : vector<64x1xf32>
    %47 = arith.subf %39, %46 : vector<64x1xf32>
    %48 = arith.addf %45, %47 : vector<64x1xf32>
    %cst_15 = arith.constant 1.000000e+04 : f32
    %49 = vector.broadcast %cst_15 : f32 to vector<64x1xf32>
    %50 = arith.mulf %48, %49 : vector<64x1xf32>
    %c0_16 = arith.constant 0 : index
    %c0_17 = arith.constant 0 : index
    %51 = vector.load %arg4[%c0_16, %c0_17] : memref<64x1xf32, #tpu.memory_space<vmem>>, vector<64x1xf32>
    tpu.vector_store %arg4[%c0_16, %c0_17], %50 {strides = array<i32>} : memref<64x1xf32, #tpu.memory_space<vmem>>, vector<64x1xf32>,
    return
  }
  func.func @transform_0(%arg0: i32) -> (i32, i32) {
    %c0_i32 = arith.constant 0 : i32
    %c0_i32_0 = arith.constant 0 : i32
    return %arg0, %c0_i32 : i32, i32
  }
  func.func @transform_1(%arg0: i32) -> (i32, i32) {
    %c0_i32 = arith.constant 0 : i32
    %c0_i32_0 = arith.constant 0 : i32
    return %arg0, %c0_i32 : i32, i32
  }
  func.func @transform_2(%arg0: i32) -> (i32, i32) {
    %c0_i32 = arith.constant 0 : i32
    %c0_i32_0 = arith.constant 0 : i32
    %c0_i32_1 = arith.constant 0 : i32
    return %c0_i32, %c0_i32_0 : i32, i32
  }
  func.func @transform_3(%arg0: i32) -> (i32, i32) {
    %c0_i32 = arith.constant 0 : i32
    %c0_i32_0 = arith.constant 0 : i32
    return %arg0, %c0_i32 : i32, i32
  }
  func.func @transform_4(%arg0: i32) -> (i32, i32) {
    %c0_i32 = arith.constant 0 : i32
    %c0_i32_0 = arith.constant 0 : i32
    return %arg0, %c0_i32 : i32, i32
  }
}

</mosaic_0001>

<bundles_post_ra>
// kernel: tpu_custom_call.1
= control target key start
LH: loop header
LB: loop body
LE: loop exit
PB: predicated region body
PF: predicated region fallthrough
CT: control target
= control target key end

     0   :  { %10 = vsyncpa [#allocation3], 0  ;;  %s708_s18 = smov [#allocation2]   ;;  %s709_s20 = smov 128   ;;  %s1313_s0 = inlined_call_operand.vmem [shape: f32[64,128], index: 0, kind: input, shape index: {}]   ;;  %s1314_s1 = inlined_call_operand.hbm [shape: f32[64,128], index: 1, kind: input, shape index: {}]   ;;  %s1315_s2 = inlined_call_operand.vmem [shape: s32[64,1], index: 2, kind: input, shape index: {}]   ;;  %s1316_s3 = inlined_call_operand.vmem [shape: f32[64,1], index: 3, kind: output, shape index: {0}]   ;;  %s1317_s4 = inlined_call_operand.vmem [shape: f32[64,1], index: 4, kind: output, shape index: {1}]  }
   0x1   :  { %s17_s17 = sshll.u32 %s1314_s1, 4  ;;  %s19_s19 = sshll.u32 %s708_s18, 4  ;;  %s18_s17 = int_to_ptr.hbm [resolvable:$true] %s17_s17  ;;  %s20_s19 = int_to_ptr.vmem [resolvable:$true] %s19_s19 }
   0x2   :  { %s710_s21 = smov 8  }
   0x3   :  { %25 = dma.hbm_to_vmem [thread:$0]  %s18_s17, 1024, %s20_s19, [#allocation3], %s709_s20, %s709_s20, %s710_s21  }
   0x4   :  { %706 = dma.done.wait [#allocation3], 1024  }
   0x5   :  { %707 = vsyncadd [#allocation3], 4294966272  ;;  %v740_v0 = vld [vmem:[#allocation2 + $0x20] sm:$0xff]  ;;  %v742_v1 = vld [vmem:[#allocation2 + $0x10] sm:$0xff]  ;;  %v90_v16 = vlaneseq }
   0x6   :  { %v40_v2 = vld [vmem:[#allocation2] sm:$0xff]  ;;  %66 = vmax.xlane.f32.xlu2 %v740_v0  ;;  %62 = vmax.xlane.f32.xlu1 %v742_v1  ;;  %v746_v3 = vld [vmem:[#allocation2 + $0x28] sm:$0xff]  ;;  %v43_v4 = vld [vmem:[#allocation2 + $0x18] sm:$0xff] }
   0x7   :  { %58 = vmax.xlane.f32.xlu0 %v40_v2  ;;  %v748_v5 = vld [vmem:[#allocation2 + $0x8] sm:$0xff]  ;;  %v752_v6 = vld [vmem:[#allocation2 + $0x38] sm:$0xff]  ;;  %v757_v7 = vld [vmem:[%s1313_s0] sm:$0xff]  ;;  %v91_v17 = vand.u32 127, %v90_v16 }
   0x8   :  { %v759_v8 = vld [vmem:[#allocation2 + $0x30] sm:$0xff]  ;;  %v772_v10 = vld [vmem:[%s1313_s0 + $0x18] sm:$0xff]  ;;  %v777_v11 = vld [vmem:[%s1313_s0 + $0x8] sm:$0xff] }
   0x9   :  { %v767_v9 = vld [vmem:[%s1313_s0 + $0x10] sm:$0xff]  ;;  %v785_v12 = vld [vmem:[%s1313_s0 + $0x28] sm:$0xff]  ;;  %v795_v14 = vld [vmem:[%s1313_s0 + $0x20] sm:$0xff] }
   0xa   :  { %v790_v13 = vld [vmem:[%s1313_s0 + $0x30] sm:$0xff]  ;;  %v803_v15 = vld [vmem:[%s1313_s0 + $0x38] sm:$0xff] }
   0xe   :  { %68 = vmax.xlane.f32.xlu2 %v746_v3  ;;  %64 = vmax.xlane.f32.xlu1 %v43_v4 }
   0xf   :  { %60 = vmax.xlane.f32.xlu0 %v748_v5 }
  0x16   :  { %72 = vmax.xlane.f32.xlu1 %v752_v6  ;;  %74 = vmax.xlane.f32.xlu2 %v757_v7 }
  0x17   :  { %70 = vmax.xlane.f32.xlu0 %v759_v8 }
  0x1e   :  { %78 = vmax.xlane.f32.xlu1 %v767_v9  ;;  %80 = vmax.xlane.f32.xlu2 %v772_v10 }
  0x1f   :  { %76 = vmax.xlane.f32.xlu0 %v777_v11 }
  0x26   :  { %84 = vmax.xlane.f32.xlu1 %v785_v12  ;;  %86 = vmax.xlane.f32.xlu2 %v790_v13 }
  0x27   :  { %82 = vmax.xlane.f32.xlu0 %v795_v14 }
  0x2f   :  { %88 = vmax.xlane.f32.xlu0 %v803_v15 }
  0x79   :  { %v806_v18 = vpop.xlane.xlu2 %66  ;;  %v63_v19 = vpop.xlane.xlu1 %62 }
  0x7a   :  { %vm94_vm0 = vcmp.eq.f32.partialorder %v742_v1, %v63_v19  ;;  %v59_v20 = vpop.xlane.xlu0 %58  ;;  %vm96_vm2 = vcmp.eq.f32.partialorder %v740_v0, %v806_v18  ;;  %v287_v40 = vsub.f32 %v742_v1, %v63_v19  ;;  %v289_v16 = vsub.f32 %v740_v0, %v806_v18 }
  0x7b   :  { %v809_v21 = vsel %vm94_vm0, %v91_v17, 128  ;;  %vm92_vm1 = vcmp.eq.f32.partialorder %v40_v2, %v59_v20  ;;  %v285_v26 = vsub.f32 %v40_v2, %v59_v20  ;;  %v836_v39 = vsel %vm96_vm2, %v91_v17, 128 }
  0x7c   :  { %v811_v22 = vsel %vm92_vm1, %v91_v17, 128  ;;  %v137_v23 = vshra.s32 %v809_v21, 16  ;;  %v165_v48 = vshra.s32 %v836_v39, 16  ;;  %v851_v49 = vmul.f32 0.01, %v287_v40 }
  0x7d   :  { %v109_v24 = vshra.s32 %v811_v22, 16  ;;  %v824_v31 = vmul.f32 0.01, %v285_v26 }
  0x7e   :  { %v815_v25 = vcvt.s32.f32 %v137_v23  ;;  %v863_v57 = vcvt.s32.f32 %v165_v48  ;;  %v305_v58 = vmul.f32 1.442695, %v851_v49 }
  0x7f   :  { %v817_v27 = vcvt.s32.f32 %v109_v24  ;;  %v301_v42 = vmul.f32 1.442695, %v824_v31 }
  0x80   :  { %140 = vmin.xlane.f32.xlu2 %v815_v25 }
  0x81   :  { %112 = vmin.xlane.f32.xlu1 %v817_v27  ;;  %v69_v28 = vpop.xlane.xlu2 %68  ;;  %v65_v29 = vpop.xlane.xlu1 %64  ;;  %602 = vpow2.f32 %v301_v42 }
  0x82   :  { %vm97_vm3 = vcmp.eq.f32.partialorder %v746_v3, %v69_v28  ;;  %vm95_vm4 = vcmp.eq.f32.partialorder %v43_v4, %v65_v29  ;;  %v61_v30 = vpop.xlane.xlu0 %60  ;;  %v288_v36 = vsub.f32 %v43_v4, %v65_v29  ;;  %v290_v50 = vsub.f32 %v746_v3, %v69_v28 }
  0x83   :  { %v826_v32 = vsel %vm97_vm3, %v91_v17, 128  ;;  %v828_v33 = vsel %vm95_vm4, %v91_v17, 128  ;;  %vm93_vm5 = vcmp.eq.f32.partialorder %v748_v5, %v61_v30  ;;  %v286_v56 = vsub.f32 %v748_v5, %v61_v30 }
  0x84   :  { %v831_v34 = vsel %vm93_vm5, %v91_v17, 128  ;;  %v151_v35 = vshra.s32 %v828_v33, 16  ;;  %v179_v38 = vshra.s32 %v826_v32, 16  ;;  %v846_v45 = vmul.f32 0.01, %v288_v36 }
  0x85   :  { %v123_v37 = vshra.s32 %v831_v34, 16  ;;  %v298_v59 = vmul.f32 0.01, %v290_v50  ;;  %v872_v1 = vmul.f32 0.01, %v286_v56 }
  0x86   :  { %v839_v41 = vcvt.s32.f32 %v151_v35  ;;  %v844_v44 = vcvt.s32.f32 %v179_v38  ;;  %v307_v55 = vmul.f32 1.442695, %v846_v45  ;;  %v889_v28 = vmul.f32 0.01, %v289_v16 }
  0x87   :  { %v842_v43 = vcvt.s32.f32 %v123_v37  ;;  %v870_v63 = vpop.eup %602  ;;  %v311_v5 = vmul.f32 1.442695, %v298_v59  ;;  %v303_v19 = vmul.f32 1.442695, %v872_v1 }
  0x88   :  { %182 = vmin.xlane.f32.xlu2 %v844_v44  ;;  %604 = vpow2.f32 %v307_v55 }
  0x89   :  { %154 = vmin.xlane.f32.xlu1 %v839_v41  ;;  %126 = vmin.xlane.f32.xlu0 %v842_v43  ;;  %v73_v46 = vpop.xlane.xlu1 %72  ;;  %v75_v47 = vpop.xlane.xlu2 %74  ;;  %606 = vpow2.f32 %v305_v58 }
  0x8a   :  { %vm99_vm6 = vcmp.eq.f32.partialorder %v752_v6, %v73_v46  ;;  %v71_v51 = vpop.xlane.xlu0 %70  ;;  %608 = vpow2.f32 %v311_v5  ;;  %v292_v23 = vsub.f32 %v752_v6, %v73_v46  ;;  %v269_v24 = vsub.f32 %v757_v7, %v75_v47 }
  0x8b   :  { %v856_v52 = vsel %vm99_vm6, %v91_v17, 128  ;;  %vm98_vm7 = vcmp.eq.f32.partialorder %v759_v8, %v71_v51  ;;  %v291_v53 = vsub.f32 %v759_v8, %v71_v51 }
  0x8c   :  { %v207_v54 = vshra.s32 %v856_v52, 16  ;;  %v866_v60 = vsel %vm98_vm7, %v91_v17, 128  ;;  %v300_v35 = vmul.f32 0.01, %v292_v23  ;;  %v896_v6 = vmul.f32 0.01, %v269_v24 }
  0x8d   :  { %v299_v62 = vmul.f32 0.01, %v291_v53  ;;  %v193_v4 = vshra.s32 %v866_v60, 16 }
  0x8e   :  { %v868_v61 = vcvt.s32.f32 %v207_v54  ;;  %v887_v26 = vpop.eup %604  ;;  %v333_v42 = vmul.f32 1.442695, %v896_v6  ;;  %v315_v51 = vmul.f32 1.442695, %v300_v35 }
  0x8f   :  { %v313_v17 = vmul.f32 1.442695, %v299_v62  ;;  %v883_v20 = vcvt.s32.f32 %v193_v4  ;;  %v892_v30 = vpop.eup %606 }
  0x90   :  { %317 = vadd.xlane.f32.xlu2 %v870_v63  ;;  %v609_v40 = vpop.eup %608 }
  0x91   :  { %210 = vmin.xlane.f32.xlu1 %v868_v61  ;;  %168 = vmin.xlane.f32.xlu0 %v863_v57  ;;  %v876_v2 = vpop.xlane.xlu1 %78  ;;  %v81_v3 = vpop.xlane.xlu2 %80  ;;  %610 = vpow2.f32 %v313_v17 }
  0x92   :  { %v77_v8 = vpop.xlane.xlu0 %76  ;;  %612 = vpow2.f32 %v303_v19  ;;  %v272_v53 = vsub.f32 %v772_v10, %v81_v3 }
  0x93   :  { %v270_v29 = vsub.f32 %v777_v11, %v77_v8  ;;  %v309_v11 = vmul.f32 1.442695, %v889_v28 }
  0x94   :  { %v280_v4 = vmul.f32 0.01, %v272_v53 }
  0x95   :  { %v902_v38 = vmul.f32 0.01, %v270_v29  ;;  %614 = vpow2.f32 %v309_v11 }
  0x96   :  { %616 = vpow2.f32 %v333_v42 }
  0x97   :  { %v611_v48 = vpop.eup %610  ;;  %v335_v50 = vmul.f32 1.442695, %v902_v38 }
  0x98   :  { %323 = vadd.xlane.f32.xlu2 %v887_v26  ;;  %v613_v55 = vpop.eup %612 }
  0x99   :  { %321 = vadd.xlane.f32.xlu1 %v892_v30  ;;  %196 = vmin.xlane.f32.xlu0 %v883_v20  ;;  %v85_v0 = vpop.xlane.xlu1 %84  ;;  %v87_v18 = vpop.xlane.xlu2 %86  ;;  %618 = vpow2.f32 %v335_v50 }
  0x9a   :  { %v274_v7 = vsub.f32 %v785_v12, %v85_v0  ;;  %v83_v36 = vpop.xlane.xlu0 %82  ;;  %v275_v37 = vsub.f32 %v790_v13, %v87_v18  ;;  %620 = vpow2.f32 %v315_v51 }
  0x9b   :  { %v273_v13 = vsub.f32 %v795_v14, %v83_v36  ;;  %v271_v14 = vsub.f32 %v767_v9, %v876_v2 }
  0x9c   :  { %v282_v46 = vmul.f32 0.01, %v274_v7  ;;  %v283_v47 = vmul.f32 0.01, %v275_v37 }
  0x9d   :  { %v281_v8 = vmul.f32 0.01, %v273_v13  ;;  %v279_v29 = vmul.f32 0.01, %v271_v14 }
  0x9e   :  { %v386_v54 = vsub.f32 %v298_v59, %v282_v46  ;;  %v387_v12 = vsub.f32 %v299_v62, %v283_v47  ;;  %v339_v59 = vmul.f32 1.442695, %v280_v4  ;;  %v615_v62 = vpop.eup %614  ;;  %v345_v18 = vmul.f32 1.442695, %v283_v47 }
  0x9f   :  { %v341_v3 = vmul.f32 1.442695, %v281_v8  ;;  %v617_v17 = vpop.eup %616  ;;  %v343_v9 = vmul.f32 1.442695, %v282_v46  ;;  %v383_v42 = vsub.f32 %v851_v49, %v279_v29  ;;  %v381_v46 = vsub.f32 %v824_v31, %v896_v6 }
  0xa0   :  { %v908_v56 = vmul.f32 %v609_v40, %v386_v54  ;;  %v910_v58 = vmul.f32 %v611_v48, %v387_v12  ;;  %329 = vadd.xlane.f32.xlu2 %v611_v48  ;;  %v619_v19 = vpop.eup %618  ;;  %622 = vpow2.f32 %v339_v59  ;;  %v385_v51 = vsub.f32 %v889_v28, %v281_v8 }
  0xa1   :  { %327 = vadd.xlane.f32.xlu1 %v609_v40  ;;  %319 = vadd.xlane.f32.xlu0 %v613_v55  ;;  %v621_v24 = vpop.eup %620  ;;  %624 = vpow2.f32 %v341_v3  ;;  %v382_v40 = vsub.f32 %v872_v1, %v902_v38  ;;  %v391_v50 = vmul.f32 %v892_v30, %v383_v42  ;;  %v389_v53 = vmul.f32 %v870_v63, %v381_v46 }
  0xa2   :  { %v89_v5 = vpop.xlane.xlu0 %88  ;;  %v393_v54 = vmul.f32 %v615_v62, %v385_v51  ;;  %v384_v1 = vsub.f32 %v846_v45, %v280_v4  ;;  %v136_v30 = vand.u32 65535, %v809_v21  ;;  %v108_v38 = vand.u32 65535, %v811_v22 }
  0xa3   :  { %v276_v10 = vsub.f32 %v803_v15, %v89_v5  ;;  %v337_v15 = vmul.f32 1.442695, %v279_v29  ;;  %v390_v48 = vmul.f32 %v613_v55, %v382_v40  ;;  %v150_v21 = vand.u32 65535, %v828_v33 }
  0xa4   :  { %v392_v49 = vmul.f32 %v887_v26, %v384_v1  ;;  %v138_v55 = vcvt.s32.f32 %v136_v30  ;;  %v110_v28 = vcvt.s32.f32 %v108_v38  ;;  %v122_v22 = vand.u32 65535, %v831_v34 }
  0xa5   :  { %v284_v16 = vmul.f32 0.01, %v276_v10  ;;  %626 = vpow2.f32 %v337_v15  ;;  %v152_v13 = vcvt.s32.f32 %v150_v21  ;;  %v164_v33 = vand.u32 65535, %v836_v39 }
  0xa6   :  { %v623_v36 = vpop.eup %622  ;;  %628 = vpow2.f32 %v345_v18  ;;  %v124_v4 = vcvt.s32.f32 %v122_v22  ;;  %v178_v34 = vand.u32 65535, %v826_v32  ;;  %v206_v32 = vand.u32 65535, %v856_v52 }
  0xa7   :  { %v388_v23 = vsub.f32 %v300_v35, %v284_v16  ;;  %v347_v7 = vmul.f32 1.442695, %v284_v16  ;;  %v625_v37 = vpop.eup %624  ;;  %v166_v59 = vcvt.s32.f32 %v164_v33  ;;  %v192_v39 = vand.u32 65535, %v866_v60 }
  0xa8   :  { %351 = vadd.xlane.f32.xlu2 %v619_v19  ;;  %v208_v16 = vcvt.s32.f32 %v206_v32 }
  0xa9   :  { %325 = vadd.xlane.f32.xlu0 %v615_v62  ;;  %349 = vadd.xlane.f32.xlu1 %v617_v17  ;;  %v915_v0 = vmul.f32 %v621_v24, %v388_v23  ;;  %630 = vpow2.f32 %v347_v7  ;;  %v194_v17 = vcvt.s32.f32 %v192_v39 }
  0xaa   :  { %632 = vpow2.f32 %v343_v9 }
  0xab   :  { %v627_v2 = vpop.eup %626 }
  0xac   :  { %v629_v35 = vpop.eup %628 }
  0xaf   :  { %v631_v11 = vpop.eup %630 }
  0xb0   :  { %357 = vadd.xlane.f32.xlu2 %v625_v37  ;;  %v633_v47 = vpop.eup %632 }
  0xb1   :  { %331 = vadd.xlane.f32.xlu0 %v621_v24  ;;  %355 = vadd.xlane.f32.xlu1 %v623_v36 }
  0xb8   :  { %363 = vadd.xlane.f32.xlu2 %v631_v11 }
  0xb9   :  { %353 = vadd.xlane.f32.xlu0 %v627_v2  ;;  %361 = vadd.xlane.f32.xlu1 %v629_v35 }
  0xc0   :  { %401 = vadd.xlane.f32.xlu2 %v391_v50 }
  0xc1   :  { %359 = vadd.xlane.f32.xlu0 %v633_v47  ;;  %399 = vadd.xlane.f32.xlu1 %v390_v48 }
  0xc9   :  { %397 = vadd.xlane.f32.xlu0 %v389_v53  ;;  %405 = vadd.xlane.f32.xlu1 %v393_v54 }
  0xd1   :  { %403 = vadd.xlane.f32.xlu0 %v392_v49 }
  0xf3   :  { %v929_v12 = vpop.xlane.xlu2 %140 }
  0xf4   :  { %v931_v31 = vpop.xlane.xlu1 %112  ;;  %vm142_vm8 = vcmp.eq.f32.partialorder %v815_v25, %v929_v12 }
  0xf5   :  { %vm114_vm9 = vcmp.eq.f32.partialorder %v817_v27, %v931_v31  ;;  %v143_v45 = vsel %vm142_vm8, %v138_v55, inf }
  0xf6   :  { %v115_v63 = vsel %vm114_vm9, %v110_v28, inf  ;;  %144 = vmin.xlane.f32.xlu0 %v143_v45 }
  0xf7   :  { %116 = vmin.xlane.f32.xlu2 %v115_v63 }
  0xfb   :  { %v943_v5 = vpop.xlane.xlu2 %182 }
  0xfc   :  { %v939_v26 = vpop.xlane.xlu1 %154  ;;  %v941_v6 = vpop.xlane.xlu0 %126  ;;  %vm184_vm12 = vcmp.eq.f32.partialorder %v844_v44, %v943_v5 }
  0xfd   :  { %vm156_vm10 = vcmp.eq.f32.partialorder %v839_v41, %v939_v26  ;;  %vm128_vm11 = vcmp.eq.f32.partialorder %v842_v43, %v941_v6  ;;  %v180_v41 = vcvt.s32.f32 %v178_v34 }
  0xfe   :  { %v157_v25 = vsel %vm156_vm10, %v152_v13, inf  ;;  %v129_v27 = vsel %vm128_vm11, %v124_v4, inf }
  0xff   :  { %158 = vmin.xlane.f32.xlu2 %v157_v25  ;;  %130 = vmin.xlane.f32.xlu1 %v129_v27  ;;  %v185_v14 = vsel %vm184_vm12, %v180_v41, inf }
 0x103   :  { %v957_v62 = vpop.xlane.xlu2 %317 }
 0x104   :  { %v953_v8 = vpop.xlane.xlu1 %210  ;;  %v955_v10 = vpop.xlane.xlu0 %168  ;;  %v424_v11 = vand.u32 2147483648, %v957_v62  ;;  %vm418_vm0 = vweird.f32 %v957_v62  ;;  %v422_v50 = vand.u32 2147483647, %v957_v62 }
 0x105   :  { %vm170_vm13 = vcmp.eq.f32.partialorder %v863_v57, %v955_v10  ;;  %vm212_vm14 = vcmp.eq.f32.partialorder %v868_v61, %v953_v8 }
 0x106   :  { %v171_v43 = vsel %vm170_vm13, %v166_v59, inf  ;;  %v213_v57 = vsel %vm212_vm14, %v208_v16, inf  ;;  %v1019_v53 = vor.u32 1.1754944e-38, %v424_v11  ;;  %vm1085_vm11 = vcmp.eq.f32.partialorder %v422_v50, 8.507059e+37 }
 0x107   :  { %172 = vmin.xlane.f32.xlu1 %v171_v43  ;;  %186 = vmin.xlane.f32.xlu2 %v185_v14  ;;  %vm260_vm14 = vcmask 7168  }
 0x10b   :  { %v969_v19 = vpop.xlane.xlu2 %323 }
 0x10c   :  { %v965_v44 = vpop.xlane.xlu1 %321  ;;  %v967_v3 = vpop.xlane.xlu0 %196 }
 0x10d   :  { %vm198_vm15 = vcmp.eq.f32.partialorder %v883_v20, %v967_v3  ;;  %634 = vrcp.f32 %v965_v44  ;;  %vm446_vm1 = vweird.f32 %v965_v44  ;;  %v450_v54 = vand.u32 2147483647, %v965_v44 }
 0x10e   :  { %v199_v23 = vsel %vm198_vm15, %v194_v17, inf  ;;  %v452_v30 = vand.u32 2147483648, %v965_v44 }
 0x10f   :  { %214 = vmin.xlane.f32.xlu1 %v213_v57  ;;  %200 = vmin.xlane.f32.xlu0 %v199_v23  ;;  %vm1038_vm5 = vcmp.eq.f32.partialorder %v450_v54, 8.507059e+37 }
 0x110   :  { %407 = vadd.xlane.f32.xlu2 %v908_v56  ;;  %v453_v43 = vor.u32 1.1754944e-38, %v452_v30 }
 0x113   :  { %v978_v61 = vpop.xlane.xlu2 %329  ;;  %v987_v56 = vpop.eup %634 }
 0x114   :  { %v974_v52 = vpop.xlane.xlu1 %327  ;;  %v976_v60 = vpop.xlane.xlu0 %319  ;;  %v442_v7 = vmul.f32 %v987_v56, %v965_v44  ;;  %vm447_vm3 = vweird.f32 %v987_v56 }
 0x115   :  { %636 = vrcp.f32 %v976_v60  ;;  %v436_v45 = vand.u32 2147483647, %v976_v60  ;;  %v438_v27 = vand.u32 2147483648, %v976_v60  ;;  %vm432_vm6 = vweird.f32 %v976_v60  ;;  %vm1050_vm7 = vmor %vm446_vm1, %vm447_vm3 }
 0x116   :  { %638 = vrcp.f32 %v957_v62  ;;  %v443_v9 = vsub.f32 1.0, %v442_v7 }
 0x117   :  { %411 = vadd.xlane.f32.xlu1 %v915_v0  ;;  %409 = vadd.xlane.f32.xlu0 %v910_v58  ;;  %vm1067_vm9 = vcmp.eq.f32.partialorder %v436_v45, 8.507059e+37 }
 0x118   :  { %v444_v48 = vmul.f32 %v987_v56, %v443_v9 }
 0x11a   :  { %v445_v63 = vadd.f32 %v987_v56, %v444_v48 }
 0x11b   :  { %v352_v29 = vpop.xlane.xlu2 %351  ;;  %v989_v15 = vpop.eup %636 }
 0x11c   :  { %v985_v20 = vpop.xlane.xlu0 %325  ;;  %v350_v24 = vpop.xlane.xlu1 %349  ;;  %v428_v58 = vmul.f32 %v989_v15, %v976_v60  ;;  %vm433_vm4 = vweird.f32 %v989_v15 }
 0x11d   :  { %v991_v18 = vpop.eup %638  ;;  %640 = vrcp.f32 %v985_v20  ;;  %vm1056_vm8 = vmor %vm432_vm6, %vm433_vm4  ;;  %vm474_vm13 = vweird.f32 %v985_v20 }
 0x11e   :  { %v414_v0 = vmul.f32 %v991_v18, %v957_v62  ;;  %642 = vrcp.f32 %v969_v19  ;;  %v429_v35 = vsub.f32 1.0, %v428_v58  ;;  %vm419_vm2 = vweird.f32 %v991_v18 }
 0x11f   :  { %644 = vlog2.f32 %v965_v44  ;;  %v449_v44 = vsel %vm1050_vm7, %v987_v56, %v445_v63  ;;  %vm1075_vm10 = vmor %vm418_vm0, %vm419_vm2  ;;  %v439_v58 = vor.u32 1.1754944e-38, %v438_v27  ;;  %v478_v27 = vand.u32 2147483647, %v985_v20 }
 0x120   :  { %v415_v42 = vsub.f32 1.0, %v414_v0  ;;  %646 = vlog2.f32 %v352_v29  ;;  %v430_v51 = vmul.f32 %v989_v15, %v429_v35  ;;  %v480_v35 = vand.u32 2147483648, %v985_v20 }
 0x121   :  { %648 = vlog2.f32 %v957_v62  ;;  %vm479_vm0 = vcmp.eq.f32.partialorder %v478_v27, 8.507059e+37  ;;  %vm460_vm2 = vweird.f32 %v969_v19 }
 0x122   :  { %650 = vlog2.f32 %v976_v60  ;;  %v416_v1 = vmul.f32 %v991_v18, %v415_v42  ;;  %v431_v13 = vadd.f32 %v989_v15, %v430_v51 }
 0x123   :  { %v358_v2 = vpop.xlane.xlu2 %357  ;;  %v1006_v40 = vpop.eup %640  ;;  %652 = vlog2.f32 %v978_v61 }
 0x124   :  { %v1001_v36 = vpop.xlane.xlu0 %331  ;;  %v1003_v37 = vpop.xlane.xlu1 %355  ;;  %v470_v46 = vmul.f32 %v1006_v40, %v985_v20  ;;  %654 = vlog2.f32 %v350_v24  ;;  %v1043_v34 = vadd.f32 %v991_v18, %v416_v1  ;;  %v435_v23 = vsel %vm1056_vm8, %v989_v15, %v431_v13 }
 0x125   :  { %v1009_v47 = vpop.eup %642  ;;  %656 = vlog2.f32 %v1001_v36  ;;  %vm475_vm12 = vweird.f32 %v1006_v40 }
 0x126   :  { %v456_v49 = vmul.f32 %v1009_v47, %v969_v19  ;;  %v645_v38 = vpop.eup %644  ;;  %v471_v4 = vsub.f32 1.0, %v470_v46  ;;  %v421_v15 = vsel %vm1075_vm10, %v991_v18, %v1043_v34  ;;  %v440_v18 = vsel %vm1067_vm9, %v439_v58, %v435_v23  ;;  %vm1114_vm15 = vmor %vm474_vm13, %vm475_vm12 }
 0x127   :  { %v647_v21 = vpop.eup %646  ;;  %v538_v16 = vmul.f32 0.6931472, %v645_v38  ;;  %vm461_vm1 = vweird.f32 %v1009_v47  ;;  %vm488_vm10 = vweird.f32 %v974_v52 }
 0x128   :  { %v1035_v25 = vpop.eup %648  ;;  %v457_v14 = vsub.f32 1.0, %v456_v49  ;;  %v368_v39 = vmul.f32 0.6931472, %v647_v21  ;;  %v472_v56 = vmul.f32 %v1006_v40, %v471_v4  ;;  %vm462_vm3 = vmor %vm460_vm2, %vm461_vm1  ;;  %vm502_vm2 = vweird.f32 %v978_v61 }
 0x129   :  { %v651_v59 = vpop.eup %650 }
 0x12a   :  { %v653_v32 = vpop.eup %652  ;;  %v536_v7 = vmul.f32 0.6931472, %v651_v59  ;;  %v458_v11 = vmul.f32 %v1009_v47, %v457_v14  ;;  %v473_v38 = vadd.f32 %v1006_v40, %v472_v56 }
 0x12b   :  { %v364_v22 = vpop.xlane.xlu2 %363  ;;  %v655_v57 = vpop.eup %654  ;;  %v1089_v9 = vmul.f32 0.6931472, %v653_v32 }
 0x12c   :  { %v354_v55 = vpop.xlane.xlu0 %353  ;;  %v362_v28 = vpop.xlane.xlu1 %361  ;;  %v550_v48 = vsub.f32 %v368_v39, %v536_v7  ;;  %v459_v56 = vadd.f32 %v1009_v47, %v458_v11 }
 0x12d   :  { %658 = vlog2.f32 %v354_v55  ;;  %v657_v29 = vpop.eup %656 }
 0x12e   :  { %660 = vlog2.f32 %v362_v28  ;;  %v1101_v45 = vmul.f32 0.6931472, %v657_v29 }
 0x12f   :  { %662 = vlog2.f32 %v364_v22 }
 0x130   :  { %664 = vlog2.f32 %v358_v2  ;;  %v454_v2 = vsel %vm1038_vm5, %v453_v43, %v449_v44  ;;  %v366_v43 = vmul.f32 0.6931472, %v655_v57  ;;  %v426_v57 = vsel %vm1085_vm11, %v1019_v53, %v421_v15 }
 0x131   :  { %666 = vlog2.f32 %v974_v52 }
 0x132   :  { %668 = vlog2.f32 %v985_v20  ;;  %v477_v20 = vsel %vm1114_vm15, %v1006_v40, %v473_v38 }
 0x133   :  { %v659_v62 = vpop.eup %658  ;;  %v402_v30 = vpop.xlane.xlu2 %401 }
 0x134   :  { %v661_v42 = vpop.eup %660  ;;  %v370_v46 = vmul.f32 0.6931472, %v659_v62  ;;  %v360_v51 = vpop.xlane.xlu0 %359  ;;  %v527_v21 = vmul.f32 %v454_v2, %v402_v30  ;;  %v466_v62 = vand.u32 2147483648, %v969_v19 }
 0x135   :  { %v400_v50 = vpop.xlane.xlu1 %399  ;;  %v663_v54 = vpop.eup %662  ;;  %v1098_v1 = vmul.f32 0.6931472, %v661_v42  ;;  %670 = vlog2.f32 %v360_v51  ;;  %v464_v42 = vand.u32 2147483647, %v969_v19 }
 0x136   :  { %v526_v49 = vmul.f32 %v440_v18, %v400_v50  ;;  %v665_v55 = vpop.eup %664  ;;  %v551_v28 = vsub.f32 %v370_v46, %v538_v16  ;;  %v1103_v63 = vmul.f32 0.6931472, %v663_v54  ;;  %672 = vlog2.f32 %v1003_v37 }
 0x137   :  { %v667_v22 = vpop.eup %666  ;;  %v555_v13 = vsub.f32 %v1098_v1, %v1089_v9  ;;  %v374_v14 = vmul.f32 0.6931472, %v665_v55  ;;  %v534_v37 = vmul.f32 0.6931472, %v1035_v25  ;;  %674 = vlog2.f32 %v969_v19 }
 0x138   :  { %v558_v4 = vadd.f32 %v550_v48, %v526_v49  ;;  %v669_v33 = vpop.eup %668  ;;  %v556_v34 = vsub.f32 %v1103_v63, %v1101_v45  ;;  %v559_v59 = vadd.f32 %v551_v28, %v527_v21  ;;  %v481_v16 = vor.u32 1.1754944e-38, %v480_v35 }
 0x139   :  { %v542_v44 = vmul.f32 0.6931472, %v669_v33  ;;  %v1131_v40 = vmul.f32 0.6931472, %v667_v22  ;;  %v549_v29 = vsub.f32 %v366_v43, %v534_v37  ;;  %v463_v18 = vsel %vm462_vm3, %v1009_v47, %v459_v56  ;;  %v52_v43 = vld [vmem:[%s1315_s2 + $0x10] sm:$0xff] }
 0x13a   :  { %v566_v32 = vmul.f32 10000.0, %v558_v4  ;;  %v567_v39 = vmul.f32 10000.0, %v559_v59  ;;  %v482_v60 = vsel %vm479_vm0, %v481_v16, %v477_v20  ;;  %v467_v50 = vor.u32 1.1754944e-38, %v466_v62 }
 0x13b   :  { %v671_v17 = vpop.eup %670  ;;  %v553_v7 = vsub.f32 %v374_v14, %v542_v44  ;;  %vm465_vm4 = vcmp.eq.f32.partialorder %v464_v42, 8.507059e+37  ;;  %676 = vrcp.f32 %v974_v52  ;;  %v147_v47 = vcvt.f32.s32 %v929_v12  ;;  %v50_v12 = vld [vmem:[%s1315_s2] sm:$0xff]  ;;  %v53_v42 = vld [vmem:[%s1315_s2 + $0x18] sm:$0xff] }
 0x13c   :  { %574 = vst.msk [vmem:[%s1316_s3 + $0x8] sm:$0xff] %vm260_vm14, %v566_v32  ;;  %v1133_v25 = vmul.f32 0.6931472, %v671_v17  ;;  %v398_v23 = vpop.xlane.xlu0 %397  ;;  %v673_v15 = vpop.eup %672  ;;  %v468_v49 = vsel %vm465_vm4, %v467_v50, %v463_v18  ;;  %v119_v21 = vcvt.f32.s32 %v931_v31  ;;  %678 = vrcp.f32 %v978_v61 }
 0x13d   :  { %575 = vst.msk [vmem:[%s1316_s3 + $0x10] sm:$0xff] %vm260_vm14, %v567_v39  ;;  %v406_v24 = vpop.xlane.xlu1 %405  ;;  %v525_v53 = vmul.f32 %v426_v57, %v398_v23  ;;  %v675_v48 = vpop.eup %674  ;;  %v372_v11 = vmul.f32 0.6931472, %v673_v15  ;;  %v148_v4 = vshll.u32 %v147_v47, 16  ;;  %680 = vrcp.f32 %v1001_v36 }
 0x13e   :  { %v529_v58 = vmul.f32 %v482_v60, %v406_v24  ;;  %v554_v0 = vsub.f32 %v1133_v25, %v1131_v40  ;;  %v540_v54 = vmul.f32 0.6931472, %v675_v48  ;;  %v120_v41 = vshll.u32 %v119_v21, 16 }
 0x13f   :  { %v557_v2 = vadd.f32 %v549_v29, %v525_v53  ;;  %v161_v20 = vcvt.f32.s32 %v939_v26  ;;  %v133_v39 = vcvt.f32.s32 %v941_v6  ;;  %v711_v16 = vmov 0.0  }
 0x140   :  { %v561_v35 = vadd.f32 %v553_v7, %v529_v58  ;;  %v552_v30 = vsub.f32 %v372_v11, %v540_v54  ;;  %v175_v48 = vcvt.f32.s32 %v955_v10  ;;  %v217_v10 = vcvt.f32.s32 %v953_v8 }
 0x141   :  { %v565_v46 = vmul.f32 10000.0, %v557_v2  ;;  %v1163_v59 = vpop.eup %676  ;;  %v162_v24 = vshll.u32 %v161_v20, 16  ;;  %v134_v58 = vshll.u32 %v133_v39, 16  ;;  %v189_v2 = vcvt.f32.s32 %v943_v5 }
 0x142   :  { %v569_v51 = vmul.f32 10000.0, %v561_v35  ;;  %v484_v37 = vmul.f32 %v1163_v59, %v974_v52  ;;  %v1179_v60 = vpop.eup %678  ;;  %v51_v35 = vld [vmem:[%s1315_s2 + $0x8] sm:$0xff]  ;;  %vm489_vm9 = vweird.f32 %v1163_v59  ;;  %v218_v20 = vshll.u32 %v217_v10, 16 }
 0x143   :  { %573 = vst.msk [vmem:[%s1316_s3] sm:$0xff] %vm260_vm14, %v565_v46  ;;  %v1181_v53 = vpop.eup %680  ;;  %v498_v46 = vmul.f32 %v1179_v60, %v978_v61  ;;  %v190_v50 = vshll.u32 %v189_v2, 16  ;;  %vm1229_vm11 = vmor %vm488_vm10, %vm489_vm9  ;;  %vm503_vm0 = vweird.f32 %v1179_v60  ;;  %vm516_vm3 = vweird.f32 %v1001_v36 }
 0x144   :  { %577 = vst.msk [vmem:[%s1316_s3 + $0x20] sm:$0xff] %vm260_vm14, %v569_v51  ;;  %v404_v19 = vpop.xlane.xlu0 %403  ;;  %v485_v7 = vsub.f32 1.0, %v484_v37  ;;  %v512_v51 = vmul.f32 %v1181_v53, %v1001_v36  ;;  %vm517_vm1 = vweird.f32 %v1181_v53  ;;  %vm1262_vm4 = vmor %vm502_vm2, %vm503_vm0 }
 0x145   :  { %v528_v38 = vmul.f32 %v468_v49, %v404_v19  ;;  %v176_v49 = vshll.u32 %v175_v48, 16 }
 0x146   :  { %v486_v18 = vmul.f32 %v1163_v59, %v485_v7 }
 0x147   :  { %v560_v55 = vadd.f32 %v552_v30, %v528_v38  ;;  %v203_v30 = vcvt.f32.s32 %v967_v3  ;;  %v55_v3 = vld [vmem:[%s1315_s2 + $0x28] sm:$0xff] }
 0x148   :  { %v487_v21 = vadd.f32 %v1163_v59, %v486_v18  ;;  %v506_v18 = vand.u32 2147483647, %v978_v61 }
 0x149   :  { %v568_v28 = vmul.f32 10000.0, %v560_v55 }
 0x14a   :  { %vm507_vm9 = vcmp.eq.f32.partialorder %v506_v18, 8.507059e+37 }
 0x14b   :  { %576 = vst.msk [vmem:[%s1316_s3 + $0x18] sm:$0xff] %vm260_vm14, %v568_v28 }
 0x169   :  { %v145_v22 = vpop.xlane.xlu0 %144 }
 0x16a   :  { %v146_v27 = vcvt.f32.s32 %v145_v22  ;;  %v117_v33 = vpop.xlane.xlu2 %116  ;;  %v513_v22 = vsub.f32 1.0, %v512_v51  ;;  %v522_v51 = vand.u32 2147483648, %v1001_v36 }
 0x16b   :  { %v118_v14 = vcvt.f32.s32 %v117_v33 }
 0x16c   :  { %v149_v32 = vadd.s32 %v148_v4, %v146_v27  ;;  %v499_v4 = vsub.f32 1.0, %v498_v46  ;;  %v514_v39 = vmul.f32 %v1181_v53, %v513_v22 }
 0x16d   :  { %v121_v31 = vadd.s32 %v120_v41, %v118_v14  ;;  %v494_v14 = vand.u32 2147483648, %v974_v52 }
 0x16e   :  { %vm222_vm5 = vcmp.eq.s32.totalorder %v149_v32, %v52_v43  ;;  %v54_v43 = vld [vmem:[%s1315_s2 + $0x20] sm:$0xff] }
 0x16f   :  { %v592_v17 = vsel %vm222_vm5, 1.0, %v711_v16  ;;  %vm220_vm6 = vcmp.eq.s32.totalorder %v121_v31, %v50_v12  ;;  %v492_v31 = vand.u32 2147483647, %v974_v52  ;;  %v491_v52 = vsel %vm1229_vm11, %v1163_v59, %v487_v21  ;;  %vm1275_vm5 = vmor %vm516_vm3, %vm517_vm1 }
 0x170   :  { %v246_v44 = vmul.f32 5.0, %v592_v17  ;;  %v590_v57 = vsel %vm220_vm6, 1.0, %v711_v16  ;;  %v500_v17 = vmul.f32 %v1179_v60, %v499_v4 }
 0x171   :  { %v244_v23 = vmul.f32 5.0, %v590_v57  ;;  %vm493_vm15 = vcmp.eq.f32.partialorder %v492_v31, 8.507059e+37 }
 0x172   :  { %v254_v56 = vadd.f32 1.0, %v246_v44  ;;  %v131_v29 = vpop.xlane.xlu1 %130  ;;  %v159_v26 = vpop.xlane.xlu2 %158  ;;  %v204_v44 = vshll.u32 %v203_v30, 16  ;;  %v501_v59 = vadd.f32 %v1179_v60, %v500_v17 }
 0x173   :  { %v252_v15 = vadd.f32 1.0, %v244_v23  ;;  %v132_v6 = vcvt.f32.s32 %v131_v29  ;;  %v160_v62 = vcvt.f32.s32 %v159_v26 }
 0x174   :  { %263 = vst.msk [vmem:[%s1317_s4 + $0x10] sm:$0xff] %vm260_vm14, %v254_v56  ;;  %v508_v56 = vand.u32 2147483648, %v978_v61 }
 0x175   :  { %261 = vst.msk [vmem:[%s1317_s4] sm:$0xff] %vm260_vm14, %v252_v15  ;;  %v135_v5 = vadd.s32 %v134_v58, %v132_v6  ;;  %v163_v11 = vadd.s32 %v162_v24, %v160_v62  ;;  %v495_v24 = vor.u32 1.1754944e-38, %v494_v14  ;;  %v515_v6 = vadd.f32 %v1181_v53, %v514_v39 }
 0x177   :  { %vm221_vm7 = vcmp.eq.s32.totalorder %v135_v5, %v51_v35  ;;  %vm223_vm8 = vcmp.eq.s32.totalorder %v163_v11, %v53_v42  ;;  %v496_v15 = vsel %vm493_vm15, %v495_v24, %v491_v52  ;;  %v57_v5 = vld [vmem:[%s1315_s2 + $0x38] sm:$0xff]  ;;  %v56_v11 = vld [vmem:[%s1315_s2 + $0x30] sm:$0xff]  ;;  %v519_v30 = vsel %vm1275_vm5, %v1181_v53, %v515_v6 }
 0x178   :  { %v591_v54 = vsel %vm221_vm7, 1.0, %v711_v16  ;;  %v593_v19 = vsel %vm223_vm8, 1.0, %v711_v16 }
 0x179   :  { %v245_v38 = vmul.f32 5.0, %v591_v54  ;;  %v247_v55 = vmul.f32 5.0, %v593_v19  ;;  %v520_v54 = vand.u32 2147483647, %v1001_v36  ;;  %v509_v36 = vor.u32 1.1754944e-38, %v508_v56 }
 0x17a   :  { %v173_v28 = vpop.xlane.xlu1 %172  ;;  %v187_v47 = vpop.xlane.xlu2 %186 }
 0x17b   :  { %v253_v27 = vadd.f32 1.0, %v245_v38  ;;  %v255_v33 = vadd.f32 1.0, %v247_v55  ;;  %v174_v8 = vcvt.f32.s32 %v173_v28  ;;  %v188_v41 = vcvt.f32.s32 %v187_v47 }
 0x17c   :  { %v505_v38 = vsel %vm1262_vm4, %v1179_v60, %v501_v59  ;;  %v523_v55 = vor.u32 1.1754944e-38, %v522_v51  ;;  %vm521_vm8 = vcmp.eq.f32.partialorder %v520_v54, 8.507059e+37 }
 0x17d   :  { %262 = vst.msk [vmem:[%s1317_s4 + $0x8] sm:$0xff] %vm260_vm14, %v253_v27  ;;  %v177_v32 = vadd.s32 %v176_v49, %v174_v8  ;;  %v191_v12 = vadd.s32 %v190_v50, %v188_v41  ;;  %v510_v4 = vsel %vm507_vm9, %v509_v36, %v505_v38 }
 0x17e   :  { %264 = vst.msk [vmem:[%s1317_s4 + $0x18] sm:$0xff] %vm260_vm14, %v255_v33  ;;  %v524_v53 = vsel %vm521_vm8, %v523_v55, %v519_v30 }
 0x17f   :  { %vm224_vm12 = vcmp.eq.s32.totalorder %v177_v32, %v54_v43  ;;  %vm225_vm13 = vcmp.eq.s32.totalorder %v191_v12, %v55_v3 }
 0x180   :  { %v594_v57 = vsel %vm224_vm12, 1.0, %v711_v16  ;;  %v595_v23 = vsel %vm225_vm13, 1.0, %v711_v16 }
 0x181   :  { %v248_v29 = vmul.f32 5.0, %v594_v57  ;;  %v249_v26 = vmul.f32 5.0, %v595_v23 }
 0x182   :  { %v215_v7 = vpop.xlane.xlu1 %214  ;;  %v201_v58 = vpop.xlane.xlu0 %200 }
 0x183   :  { %v256_v62 = vadd.f32 1.0, %v248_v29  ;;  %v257_v2 = vadd.f32 1.0, %v249_v26  ;;  %v216_v35 = vcvt.f32.s32 %v215_v7  ;;  %v202_v42 = vcvt.f32.s32 %v201_v58  ;;  %v408_v48 = vpop.xlane.xlu2 %407 }
 0x184   :  { %v530_v46 = vmul.f32 %v496_v15, %v408_v48 }
 0x185   :  { %265 = vst.msk [vmem:[%s1317_s4 + $0x20] sm:$0xff] %vm260_vm14, %v256_v62  ;;  %v219_v50 = vadd.s32 %v218_v20, %v216_v35  ;;  %v205_v10 = vadd.s32 %v204_v44, %v202_v42 }
 0x186   :  { %266 = vst.msk [vmem:[%s1317_s4 + $0x28] sm:$0xff] %vm260_vm14, %v257_v2  ;;  %v562_v61 = vadd.f32 %v554_v0, %v530_v46 }
 0x187   :  { %vm227_vm6 = vcmp.eq.s32.totalorder %v219_v50, %v57_v5  ;;  %vm226_vm7 = vcmp.eq.s32.totalorder %v205_v10, %v56_v11 }
 0x188   :  { %v597_v40 = vsel %vm227_vm6, 1.0, %v711_v16  ;;  %v596_v25 = vsel %vm226_vm7, 1.0, %v711_v16  ;;  %v570_v0 = vmul.f32 10000.0, %v562_v61 }
 0x189   :  { %v251_v28 = vmul.f32 5.0, %v597_v40  ;;  %v250_v47 = vmul.f32 5.0, %v596_v25 }
 0x18a   :  { %578 = vst.msk [vmem:[%s1316_s3 + $0x28] sm:$0xff] %vm260_vm14, %v570_v0  ;;  %v412_v21 = vpop.xlane.xlu1 %411  ;;  %v410_v22 = vpop.xlane.xlu0 %409 }
 0x18b   :  { %v259_v60 = vadd.f32 1.0, %v251_v28  ;;  %v258_v27 = vadd.f32 1.0, %v250_v47  ;;  %v532_v33 = vmul.f32 %v524_v53, %v412_v21  ;;  %v531_v8 = vmul.f32 %v510_v4, %v410_v22 }
 0x18d   :  { %268 = vst.msk [vmem:[%s1317_s4 + $0x38] sm:$0xff] %vm260_vm14, %v259_v60  ;;  %v564_v16 = vadd.f32 %v556_v34, %v532_v33  ;;  %v563_v41 = vadd.f32 %v555_v13, %v531_v8 }
 0x18e   :  { %267 = vst.msk [vmem:[%s1317_s4 + $0x30] sm:$0xff] %vm260_vm14, %v258_v27 }
 0x18f   :  { %v572_v43 = vmul.f32 10000.0, %v564_v16  ;;  %v571_v3 = vmul.f32 10000.0, %v563_v41 }
 0x191   :  { %580 = vst.msk [vmem:[%s1316_s3 + $0x38] sm:$0xff] %vm260_vm14, %v572_v43 }
 0x192   :  { %579 = vst.msk [vmem:[%s1316_s3 + $0x30] sm:$0xff] %vm260_vm14, %v571_v3 }
 0x193   :  { %589 = vsyncpa [#allocation3], 1 }

</bundles_post_ra>
